<compile_context>
chip_gen: v7x
topology: tpu7x:2x2x1
jax: 0.10.0
libtpu: 0.0.40
codegen_flags: <defaults>
</compile_context>

<pallas_src>
import jax
import jax.numpy as jnp
from jax.experimental import pallas as pl
from jax.experimental.pallas import tpu as pltpu


# ----- parameter slab layout (rows x 128 lanes, f32) ------------------------
SLAB_ROWS, SLAB_COLS = 80, 128
W1_ROW = 0      # rows  0:11, cols 0:2  -> fc1.weight (10,2) + zero 11th row
FLOOR_COL = 4   # rows  0:11, col  4    -> relu "floor" column [0]*10 + [1]
W2_ROW = 16     # rows 16:66, cols 0:11 -> fc2.fc.weight (50,10) + bias as col 10
W3_ROW = 72     # rows 72:76, cols 0:50 -> fc3.weight (4,50)


def net_kernel(x_ref, p_ref, o_ref):
    xT = x_ref[...]                                   # (2, TB)  batch on lanes
    x0 = xT[0:1, :]
    x1 = xT[1:2, :]

    w1a = p_ref[W1_ROW:W1_ROW + 11, 0:2]                       # (11, 2)
    floor = p_ref[W1_ROW:W1_ROW + 11, FLOOR_COL:FLOOR_COL + 1]  # (11, 1)
    w2a = p_ref[W2_ROW:W2_ROW + 50, 0:11]                      # (50, 11)
    w3 = p_ref[W3_ROW:W3_ROW + 4, 0:50]                        # (4, 50)

    # fc1 (K=2) on the VPU.  Rows 0..9: max(pre, 0) = relu; row 10: pre = 0
    # (zero weight row) and floor = 1, so h1a's 11th row is the constant-ones
    # row that carries the fc2 bias through the MXU.  Zero extra VALU ops.
    h1a = jnp.maximum(w1a[:, 0:1] * x0 + w1a[:, 1:2] * x1, floor)   # (11, TB)

    # fc2 (+bias via the ones row) + relu — MXU, f32 accumulation.
    h2 = jnp.maximum(
        jnp.dot(w2a, h1a, preferred_element_type=jnp.float32), 0.0)  # (50, TB)

    # fc3 — MXU.
    logits = jnp.dot(w3, h2, preferred_element_type=jnp.float32)     # (4, TB)

    # softmax over the class axis (4 sublanes), max-stabilized.
    m = jnp.max(logits, axis=0, keepdims=True)
    e = jnp.exp(logits - m)
    denom = jnp.sum(e, axis=0, keepdims=True)
    o_ref[...] = (e * pl.reciprocal(denom, approx=True)).astype(o_ref.dtype)


def _round_up(n, m):
    return ((n + m - 1) // m) * m


def net_forward_t(x_t, param_slab, *, block_b=8192):
    """Core (lane-dense) API.

    x_t: (2, B) f32 — batch on the lane axis.  Returns (4, B) f32 softmax
    probabilities (class on sublanes).  No wrapper transposes.
    """
    B = x_t.shape[1]

    # TB must be a multiple of 128 (BlockSpec lane divisibility).
    block_b = max(128, (block_b // 128) * 128)
    B128 = _round_up(B, 128)
    # Cap TB at ceil(B/2) (rounded to 128) so the "parallel" grid has >=2
    # steps whenever B >= 256 -> both v7x TensorCores get work.
    half = _round_up((B128 + 1) // 2, 128)
    TB = min(block_b, half)
    B_pad = _round_up(B, TB)

    if B_pad != B:
        x_t = jnp.pad(x_t.astype(jnp.float32), ((0, 0), (0, B_pad - B)))
    else:
        x_t = x_t.astype(jnp.float32)

    out_t = pl.pallas_call(
        net_kernel,
        out_shape=jax.ShapeDtypeStruct((4, B_pad), jnp.float32),
        grid=(B_pad // TB,),
        in_specs=[
            pl.BlockSpec((2, TB), lambda i: (0, i)),                 # activations
            pl.BlockSpec((SLAB_ROWS, SLAB_COLS), lambda i: (0, 0)),  # params: 1 DMA
        ],
        out_specs=pl.BlockSpec((4, TB), lambda i: (0, i)),           # lane-dense store
        compiler_params=pltpu.CompilerParams(
            dimension_semantics=("parallel",)),                      # v7x: 2 TCs
    )(x_t, param_slab)

    return out_t[:, :B] if B_pad != B else out_t


def net_forward(x, param_slab, *, block_b=8192):
    """PyTorch-layout compatibility wrapper: x (B, 2) -> (B, 4).

    The two transposes here are pure XLA layout plumbing; callers that can
    consume the transposed (2,B)/(4,B) layout should use net_forward_t.
    """
    return net_forward_t(x.astype(jnp.float32).T, param_slab,
                         block_b=block_b).T


def pack_params(w1, w2, b2, w3):
    """Pack PyTorch-layout weights into one lane-padded f32 slab (single DMA)."""
    slab = jnp.zeros((SLAB_ROWS, SLAB_COLS), jnp.float32)
    slab = slab.at[W1_ROW:W1_ROW + 10, 0:2].set(w1)            # fc1.weight (10,2)
    slab = slab.at[W1_ROW + 10, FLOOR_COL].set(1.0)            # ones-row relu floor
    slab = slab.at[W2_ROW:W2_ROW + 50, 0:10].set(w2)           # fc2.fc.weight (50,10)
    slab = slab.at[W2_ROW:W2_ROW + 50, 10].set(b2)             # fc2.fc.bias as col 10
    slab = slab.at[W3_ROW:W3_ROW + 4, 0:50].set(w3)            # fc3.weight (4,50)
    return slab


def make_params(key):
    """PyTorch-native layouts: weight is (out_features, in_features)."""
    k1, k2, k3, k4 = jax.random.split(key, 4)
    w1 = jax.random.normal(k1, (10, 2), jnp.float32) * 0.5    # fc1.weight
    w2 = jax.random.normal(k2, (50, 10), jnp.float32) * 0.3   # fc2.fc.weight
    b2 = jax.random.normal(k3, (50,), jnp.float32) * 0.1      # fc2.fc.bias
    w3 = jax.random.normal(k4, (4, 50), jnp.float32) * 0.2    # fc3.weight
    return w1, w2, b2, w3


def net_reference(x, w1, w2, b2, w3):
    h1 = jnp.maximum(x @ w1.T, 0.0)
    h2 = jnp.maximum(h1 @ w2.T + b2, 0.0)
    logits = h2 @ w3.T
    return jax.nn.softmax(logits, axis=1)


if __name__ == "__main__":
    key = jax.random.PRNGKey(0)
    kx, kp = jax.random.split(key)

    w1, w2, b2, w3 = make_params(kp)
    slab = pack_params(w1, w2, b2, w3)

    # Small PyTorch-shaped check (B=8, padded internally to one 128-lane tile).
    B = 8
    x = jax.random.normal(kx, (B, 2), jnp.float32)
    out = jax.block_until_ready(net_forward(x, slab))
    assert out.shape == (B, 4)
    # approx=True reciprocal -> rows sum to 1 within ~1e-3
    assert jnp.allclose(jnp.sum(out, axis=1), 1.0, atol=5e-3)
    ref = net_reference(x, w1, w2, b2, w3)
    assert jnp.allclose(out, ref, atol=5e-3, rtol=5e-3)

    # 128-aligned batch through the transposed (no-plumbing) API, exercising
    # the >=2-step grid path (TB=256, grid=2) used for megacore sharding.
    B2 = 512
    x2 = jax.random.normal(jax.random.fold_in(kx, 1), (B2, 2), jnp.float32)
    out2_t = jax.block_until_ready(net_forward_t(x2.T, slab))
    assert out2_t.shape == (4, B2)
    ref2 = net_reference(x2, w1, w2, b2, w3)
    assert jnp.allclose(out2_t.T, ref2, atol=5e-3, rtol=5e-3)

    print("KERNEL_OK")
</pallas_src>

<mosaic_0001>
module attributes {stable_mosaic.version = 11 : i64} {
  func.func @net_kernel(%arg0: i32, %arg1: memref<2x128xf32, #tpu.memory_space<vmem>>, %arg2: memref<80x128xf32, #tpu.memory_space<vmem>>, %arg3: memref<4x128xf32, #tpu.memory_space<vmem>>) attributes {dimension_semantics = [#tpu.dimension_semantics<parallel>], iteration_bounds = array<i64: 1>, scalar_prefetch = 0 : i64, scratch_operands = 0 : i64, tpu.core_type = #tpu.core_type<tc>, window_params = [{transform_indices = @transform_0, window_bounds = array<i64: 2, 128>}, {pipeline_mode = #tpu.pipeline_mode<synchronous>, transform_indices = @transform_1, window_bounds = array<i64: 80, 128>}, {transform_indices = @transform_2, window_bounds = array<i64: 4, 128>}]} {
    %c0 = arith.constant 0 : index
    %c0_0 = arith.constant 0 : index
    %0 = vector.load %arg1[%c0, %c0_0] : memref<2x128xf32, #tpu.memory_space<vmem>>, vector<2x128xf32>
    %1 = vector.extract_strided_slice %0 {offsets = [0, 0], sizes = [1, 128], strides = [1, 1]} : vector<2x128xf32> to vector<1x128xf32>
    %2 = vector.extract_strided_slice %0 {offsets = [1, 0], sizes = [1, 128], strides = [1, 1]} : vector<2x128xf32> to vector<1x128xf32>
    %c0_1 = arith.constant 0 : index
    %c0_2 = arith.constant 0 : index
    %3 = vector.load %arg2[%c0_1, %c0_2] : memref<80x128xf32, #tpu.memory_space<vmem>>, vector<11x2xf32>
    %c0_3 = arith.constant 0 : index
    %c4 = arith.constant 4 : index
    %4 = vector.load %arg2[%c0_3, %c4] : memref<80x128xf32, #tpu.memory_space<vmem>>, vector<11x1xf32>
    %c16 = arith.constant 16 : index
    %c0_4 = arith.constant 0 : index
    %5 = vector.load %arg2[%c16, %c0_4] : memref<80x128xf32, #tpu.memory_space<vmem>>, vector<50x11xf32>
    %c72 = arith.constant 72 : index
    %c0_5 = arith.constant 0 : index
    %6 = vector.load %arg2[%c72, %c0_5] : memref<80x128xf32, #tpu.memory_space<vmem>>, vector<4x50xf32>
    %7 = vector.extract_strided_slice %3 {offsets = [0, 0], sizes = [11, 1], strides = [1, 1]} : vector<11x2xf32> to vector<11x1xf32>
    %8 = vector.broadcast %7 : vector<11x1xf32> to vector<11x128xf32>
    %9 = vector.broadcast %1 : vector<1x128xf32> to vector<11x128xf32>
    %10 = arith.mulf %8, %9 : vector<11x128xf32>
    %11 = vector.extract_strided_slice %3 {offsets = [0, 1], sizes = [11, 1], strides = [1, 1]} : vector<11x2xf32> to vector<11x1xf32>
    %12 = vector.broadcast %11 : vector<11x1xf32> to vector<11x128xf32>
    %13 = vector.broadcast %2 : vector<1x128xf32> to vector<11x128xf32>
    %14 = arith.mulf %12, %13 : vector<11x128xf32>
    %15 = arith.addf %10, %14 : vector<11x128xf32>
    %16 = vector.broadcast %4 : vector<11x1xf32> to vector<11x128xf32>
    %17 = arith.maximumf %15, %16 : vector<11x128xf32>
    %cst = arith.constant dense<0.000000e+00> : vector<50x128xf32>
    %18 = tpu.matmul %5, %17, %cst {dimension_numbers = #tpu.dot_dimension_numbers<[1], [0], [0], [1], [0, 0, 1, 1], [], []>} : vector<50x11xf32>, vector<11x128xf32>, vector<50x128xf32> -> vector<50x128xf32>
    %cst_6 = arith.constant 0.000000e+00 : f32
    %19 = vector.broadcast %cst_6 : f32 to vector<50x128xf32>
    %20 = arith.maximumf %18, %19 : vector<50x128xf32>
    %cst_7 = arith.constant dense<0.000000e+00> : vector<4x128xf32>
    %21 = tpu.matmul %6, %20, %cst_7 {dimension_numbers = #tpu.dot_dimension_numbers<[1], [0], [0], [1], [0, 0, 1, 1], [], []>} : vector<4x50xf32>, vector<50x128xf32>, vector<4x128xf32> -> vector<4x128xf32>
    %cst_8 = arith.constant dense<0xFF800000> : vector<128xf32>
    %22 = vector.multi_reduction <maximumf>, %21, %cst_8 [0] : vector<4x128xf32> to vector<128xf32>
    %23 = vector.shape_cast %22 : vector<128xf32> to vector<1x128xf32>
    %24 = vector.broadcast %23 : vector<1x128xf32> to vector<4x128xf32>
    %25 = arith.subf %21, %24 : vector<4x128xf32>
    %26 = math.exp %25 : vector<4x128xf32>
    %cst_9 = arith.constant dense<0.000000e+00> : vector<128xf32>
    %27 = vector.multi_reduction <add>, %26, %cst_9 [0] : vector<4x128xf32> to vector<128xf32>
    %28 = vector.shape_cast %27 : vector<128xf32> to vector<1x128xf32>
    %29 = tpu.reciprocal %28 {approx = true} : vector<1x128xf32> -> vector<1x128xf32>
    %30 = vector.broadcast %29 : vector<1x128xf32> to vector<4x128xf32>
    %31 = arith.mulf %26, %30 : vector<4x128xf32>
    %c0_10 = arith.constant 0 : index
    %c0_11 = arith.constant 0 : index
    %32 = vector.load %arg3[%c0_10, %c0_11] : memref<4x128xf32, #tpu.memory_space<vmem>>, vector<4x128xf32>
    tpu.vector_store %arg3[%c0_10, %c0_11], %31 {strides = array<i32>} : memref<4x128xf32, #tpu.memory_space<vmem>>, vector<4x128xf32>,
    return
  }
  func.func @transform_0(%arg0: i32) -> (i32, i32) {
    %c0_i32 = arith.constant 0 : i32
    %c0_i32_0 = arith.constant 0 : i32
    return %c0_i32, %arg0 : i32, i32
  }
  func.func @transform_1(%arg0: i32) -> (i32, i32) {
    %c0_i32 = arith.constant 0 : i32
    %c0_i32_0 = arith.constant 0 : i32
    %c0_i32_1 = arith.constant 0 : i32
    return %c0_i32, %c0_i32_0 : i32, i32
  }
  func.func @transform_2(%arg0: i32) -> (i32, i32) {
    %c0_i32 = arith.constant 0 : i32
    %c0_i32_0 = arith.constant 0 : i32
    return %c0_i32, %arg0 : i32, i32
  }
}

</mosaic_0001>

<bundles_post_ra>
// kernel: tpu_custom_call.1
= control target key start
LH: loop header
LB: loop body
LE: loop exit
PB: predicated region body
PF: predicated region fallthrough
CT: control target
= control target key end

     0   :  { %7 = vsyncpa [#allocation3], 0  ;;  %s615_s0 = inlined_call_operand.hbm [shape: f32[2,128], index: 0, kind: input, shape index: {}]   ;;  %s616_s1 = inlined_call_operand.hbm [shape: f32[80,128], index: 1, kind: input, shape index: {}]   ;;  %s617_s2 = inlined_call_operand.hbm [shape: f32[4,128], index: 2, kind: output, shape index: {}]  }
   0x1   :  { %8 = vsyncpa [#allocation6], 0 }
   0x2   :  { %9 = vsyncpa [#allocation4], 0  ;;  %s517_s9 = smov [#allocation2]   ;;  %s518_s11 = smov [#allocation5]  }
   0x3   :  { %s16_s10 = sshll.u32 %s517_s9, 4  ;;  %s25_s12 = sshll.u32 %s518_s11, 4  ;;  %s17_s10 = int_to_ptr.vmem [resolvable:$true] %s16_s10  ;;  %s544_s12 = int_to_ptr.vmem [resolvable:$true] %s25_s12 }
   0x4   :  { %s445_s15 = scalar_lea.hbm %s615_s0, 32 }
   0x5   :  { %p446_p0 = scmp.ne.s32.totalorder %s615_s0, %s445_s15  ;;  %p449_p1 = scmp.lt.u32.totalorder %s445_s15, %s615_s0 }
   0x7   :  { %p451_p2 = pnand %p449_p1, %p446_p0 }
   0x9   :  { %454 = shalt.err (!%p451_p2)
}
   0xa   :  { %s455_s20 = scalar_lea.vmem %s17_s10, 32  ;;  %p460_p4 = scmp.lt.s32.totalorder %s17_s10, %s17_s10 }
   0xb   :  { %p456_p3 = scmp.ne.s32.totalorder %s17_s10, %s455_s20  ;;  %p461_p5 = scmp.lt.s32.totalorder %s455_s20, %s455_s20 }
   0xd   :  { %p462_p6 = por %p461_p5, %p460_p4 }
   0xf   :  { %p463_p7 = pnand %p462_p6, %p456_p3 }
  0x11   :  { %466 = shalt.err (!%p463_p7)
}
  0x12   :  { %19 = dma.hbm_to_vmem [thread:$0]  %s615_s0, 32, %s17_s10, [#allocation3]  }
  0x13   :  { %s467_s25 = scalar_lea.hbm %s616_s1, 1280 }
  0x14   :  { %p468_p8 = scmp.ne.s32.totalorder %s616_s1, %s467_s25  ;;  %p471_p9 = scmp.lt.u32.totalorder %s467_s25, %s616_s1 }
  0x16   :  { %p473_p10 = pnand %p471_p9, %p468_p8 }
  0x18   :  { %476 = shalt.err (!%p473_p10)
}
  0x19   :  { %s477_s30 = scalar_lea.vmem %s544_s12, 1280  ;;  %p482_p12 = scmp.lt.s32.totalorder %s544_s12, %s544_s12 }
  0x1a   :  { %p478_p11 = scmp.ne.s32.totalorder %s544_s12, %s477_s30  ;;  %p483_p13 = scmp.lt.s32.totalorder %s477_s30, %s477_s30 }
  0x1c   :  { %p484_p0 = por %p483_p13, %p482_p12 }
  0x1e   :  { %p485_p1 = pnand %p484_p0, %p478_p11 }
  0x20   :  { %488 = shalt.err (!%p485_p1)
}
  0x21   :  { %s519_s0 = smov 128   ;;  %s520_s3 = smov 8  }
  0x22   :  { %31 = dma.hbm_to_vmem [thread:$0]  %s616_s1, 1280, %s544_s12, [#allocation6], %s519_s0, %s519_s0, %s520_s3  }
  0x23   :  { %511 = dma.done.wait [#allocation3], 32  }
  0x24   :  { %512 = vsyncadd [#allocation3], 4294967264 }
  0x25   :  { %513 = dma.done.wait [#allocation6], 1280  }
  0x26   :  { %514 = vsyncadd [#allocation6], 4294966016  ;;  %v521_v0 = vmov 1   ;;  %v522_v1 = vmov 0   ;;  %v39_v2 = vld [vmem:[#allocation5] sm:$0xff]  ;;  %v523_v5 = vmov 4   ;;  %v59_v8 = vlaneseq }
  0x27   :  { %434 = vset.pattern.permute.xlu1 %v521_v0  ;;  %433 = vset.pattern.permute.xlu0 %v522_v1  ;;  %v40_v3 = vld [vmem:[#allocation5 + $0x8] sm:$0x7]  ;;  %v524_v6 = vmov 0.0|0.0   ;;  %vm525_vm0 = vmmov 0   ;;  %v526_v7 = vmov 0.0   ;;  %vm113_vm1 = vcmask 1042432  }
  0x28   :  { %66 = vperm.xlu1 %434, %v39_v2   ;;  %51 = vperm.xlu0 %433, %v39_v2   ;;  %v436_v4 = vpack.i.bf16 %v40_v3, %v39_v2  ;;  %v60_v9 = vshrl.u32 %v59_v8, 7  ;;  %v38_v12 = vld [vmem:[#allocation2] sm:$0x3]  ;;  %vm527_vm2 = vmmov 1   ;;  %v41_v31 = vld [vmem:[#allocation5 + $0x10] sm:$0xff]  ;;  %vm91_vm4 = vcmask 89088  }
  0x29   :  { %408 = vmatprep.subr.bf16.mxu0 %v524_v6  ;;  %412 = vmatprep.subr.bf16.mxu1 %v524_v6  ;;  %vm410_vm3 = vmpackc.low %vm113_vm1, %vm527_vm2  ;;  %v42_v32 = vld [vmem:[#allocation5 + $0x18] sm:$0xff]  ;;  %v43_v33 = vld [vmem:[#allocation5 + $0x20] sm:$0xff]  ;;  %vm228_vm5 = vcmask 1041408   ;;  %vm224_vm6 = vcmask 408576   ;;  %vm302_vm7 = vcmask 1043456   ;;  %s528_s1 = smov [#allocation7]  }
  0x2a   :  { %370 = vmatprep.mubr.msk.f32.mxu0 %vm525_vm0, %v526_v7  ;;  %405 = vmatprep.mubr.msk.f32.mxu1 %vm525_vm0, %v526_v7  ;;  %v75_v10 = vsub.s32 1, %v60_v9  ;;  %v61_v11 = vsub.s32 0, %v60_v9  ;;  %v44_v34 = vld [vmem:[#allocation5 + $0x28] sm:$0xff]  ;;  %v45_v35 = vld [vmem:[#allocation5 + $0x30] sm:$0xff]  ;;  %v46_v36 = vld [vmem:[#allocation5 + $0x38] sm:$0xff]  ;;  %s329_s6 = sshll.u32 %s528_s1, 4  ;;  %s330_s6 = int_to_ptr.vmem [resolvable:$true] %s329_s6 }
  0x2b   :  { %v47_v37 = vld [vmem:[#allocation5 + $0x40] sm:$0x3]  ;;  %v48_v62 = vld [vmem:[#allocation5 + $0x48] sm:$0xf]  ;;  %s489_s7 = scalar_lea.vmem %s330_s6, 64  ;;  %p494_p3 = scmp.lt.s32.totalorder %s330_s6, %s330_s6 }
  0x2c   :  { %70 = vperm.xlu1 %434, %v40_v3   ;;  %56 = vperm.xlu0 %433, %v40_v3   ;;  %v76_v15 = vrot.slane %v38_v12, %v75_v10  ;;  %v62_v16 = vrot.slane %v38_v12, %v61_v11  ;;  %p490_p2 = scmp.ne.s32.totalorder %s330_s6, %s489_s7  ;;  %p495_p4 = scmp.lt.s32.totalorder %s489_s7, %s489_s7 }
  0x2e   :  { %p496_p5 = por %p495_p4, %p494_p3 }
  0x30   :  { %435 = vset.pattern.permute.xlu0 %v523_v5  ;;  %p497_p6 = pnand %p496_p5, %p490_p2 }
  0x31   :  { %437 = vperm.xlu0 %435, %v436_v4  }
  0xa7   :  { %v67_v13 = vpop.permute.xlu1 %66  ;;  %v52_v14 = vpop.permute.xlu0 %51 }
  0xa8   :  { %v77_v19 = vmul.f32 %v76_v15, %v67_v13  ;;  %v63_v20 = vmul.f32 %v62_v16, %v52_v14 }
  0xaa   :  { %v79_v24 = vadd.f32 %v77_v19, %v63_v20 }
  0xab   :  { %v71_v17 = vpop.permute.xlu1 %70  ;;  %v57_v18 = vpop.permute.xlu0 %56 }
  0xac   :  { %v78_v21 = vmul.f32 %v76_v15, %v71_v17  ;;  %v64_v22 = vmul.f32 %v62_v16, %v57_v18 }
  0xae   :  { %v80_v25 = vadd.f32 %v78_v21, %v64_v22 }
  0xb0   :  { %v438_v23 = vpop.permute.xlu0 %437 }
  0xb1   :  { %v440_v26 = vunpack.i.h.bf16 %v438_v23  ;;  %v439_v27 = vunpack.i.l.bf16 %v438_v23 }
  0xb3   :  { %v89_v28 = vmax.f32 %v79_v24, %v439_v27  ;;  %v90_v29 = vmax.f32 %v80_v25, %v440_v26 }
  0xb5   :  { %v409_v30 = vpack.c.bf16 %v90_v29, %v89_v28 }
  0xb7   :  { %411 = vmatpush3.bf16.msk.msra.mxu0 %vm410_vm3, %v409_v30 }
  0xba   :  { %371 = vmatmul.mubr.msk.f32.vlgmr.msra.gmra.mrb[0].mxu0 %vm91_vm4, %v41_v31 }
  0xbb   :  { %373 = vmatprep.mubr.msk.f32.mxu0 %vm525_vm0, %v526_v7 }
  0xbe   :  { %374 = vmatmul.mubr.msk.f32.gmra.mrb[2].mxu0 %vm91_vm4, %v42_v32 }
  0xbf   :  { %376 = vmatprep.mubr.msk.f32.mxu0 %vm525_vm0, %v526_v7 }
  0xc2   :  { %377 = vmatmul.mubr.msk.f32.gmra.mrb[4].mxu0 %vm91_vm4, %v43_v33 }
  0xc3   :  { %379 = vmatprep.mubr.msk.f32.mxu0 %vm525_vm0, %v526_v7 }
  0xc6   :  { %380 = vmatmul.mubr.msk.f32.gmra.mrb[6].mxu0 %vm91_vm4, %v44_v34 }
  0xc7   :  { %382 = vmatprep.mubr.msk.f32.mxu0 %vm525_vm0, %v526_v7 }
  0xca   :  { %383 = vmatmul.mubr.msk.f32.gmra.mrb[8].mxu0 %vm91_vm4, %v45_v35 }
  0xcb   :  { %385 = vmatprep.mubr.msk.f32.mxu0 %vm525_vm0, %v526_v7 }
  0xce   :  { %386 = vmatmul.mubr.msk.f32.gmra.mrb[10].mxu0 %vm91_vm4, %v46_v36 }
  0xcf   :  { %388 = vmatprep.mubr.msk.f32.mxu0 %vm525_vm0, %v526_v7 }
  0xd2   :  { %389 = vmatmul.mubr.msk.f32.gmra.mrb[12].mxu0 %vm91_vm4, %v47_v37 }
 0x18d   :  { %v183_v38 = vpop.f32.mrb[0].mxu0 }
 0x18e   :  { %v372_v39 = vpop.f32.mrb[1].mxu0  ;;  %v217_v41 = vmax.f32 %v183_v38, 0.0 }
 0x191   :  { %v188_v40 = vpop.f32.mrb[2].mxu0 }
 0x192   :  { %v218_v42 = vmax.f32 %v188_v40, 0.0  ;;  %v375_v43 = vpop.f32.mrb[3].mxu0 }
 0x194   :  { %v413_v44 = vpack.c.bf16 %v218_v42, %v217_v41 }
 0x195   :  { %v193_v45 = vpop.f32.mrb[4].mxu0 }
 0x196   :  { %v378_v46 = vpop.f32.mrb[5].mxu0  ;;  %414 = vmatpush3.bf16.msra.mxu1 %v413_v44  ;;  %v219_v48 = vmax.f32 %v193_v45, 0.0 }
 0x197   :  { %415 = vmatprep.subr.bf16.mxu1 %v524_v6 }
 0x199   :  { %v198_v47 = vpop.f32.mrb[6].mxu0 }
 0x19a   :  { %v220_v49 = vmax.f32 %v198_v47, 0.0  ;;  %v381_v50 = vpop.f32.mrb[7].mxu0 }
 0x19c   :  { %v416_v51 = vpack.c.bf16 %v220_v49, %v219_v48 }
 0x19d   :  { %v203_v52 = vpop.f32.mrb[8].mxu0 }
 0x19e   :  { %v384_v53 = vpop.f32.mrb[9].mxu0  ;;  %417 = vmatpush3.bf16.msra.mxu1 %v416_v51  ;;  %v221_v55 = vmax.f32 %v203_v52, 0.0 }
 0x19f   :  { %418 = vmatprep.subr.bf16.mxu1 %v524_v6 }
 0x1a1   :  { %v208_v54 = vpop.f32.mrb[10].mxu0 }
 0x1a2   :  { %v222_v56 = vmax.f32 %v208_v54, 0.0  ;;  %v387_v57 = vpop.f32.mrb[11].mxu0 }
 0x1a4   :  { %v419_v58 = vpack.c.bf16 %v222_v56, %v221_v55 }
 0x1a5   :  { %v213_v59 = vpop.f32.mrb[12].mxu0 }
 0x1a6   :  { %v223_v60 = vmax.f32 %v213_v59, 0.0  ;;  %420 = vmatpush3.bf16.msra.mxu1 %v419_v58  ;;  %v390_v61 = vpop.f32.mrb[13].mxu0 }
 0x1a7   :  { %403 = vmatprep.subr.mxu1 %v526_v7 }
 0x1aa   :  { %404 = vmatpush3.msk.msra.mxu1 %vm228_vm5, %v223_v60 }
 0x1ab   :  { %406 = vmatmul.mubr.msk.f32.vlgmr.msra.gmra.mrb[0].mxu1 %vm224_vm6, %v48_v62 }
 0x27e   :  { %v298_v63 = vpop.f32.mrb[0].mxu1 }
 0x27f   :  { %v303_v0 = vsel %vm302_vm7, %v298_v63, -inf  ;;  %v407_v1 = vpop.f32.mrb[1].mxu1 }
 0x280   :  { %v304_v2 = vrot.slane %v303_v0, 4 }
 0x282   :  { %v305_v3 = vmax.f32 %v303_v0, %v304_v2 }
 0x284   :  { %v306_v4 = vrot.slane %v305_v3, 2 }
 0x286   :  { %v307_v5 = vmax.f32 %v305_v3, %v306_v4 }
 0x288   :  { %v308_v6 = vrot.slane %v307_v5, 1 }
 0x28a   :  { %v309_v8 = vmax.f32 %v307_v5, %v308_v6 }
 0x28c   :  { %v310_v9 = vsub.f32 %v298_v63, %v309_v8 }
 0x28e   :  { %v311_v10 = vmul.f32 1.442695, %v310_v9 }
 0x290   :  { %441 = vpow2.f32 %v311_v10 }
 0x29a   :  { %v442_v11 = vpop.eup %441 }
 0x29b   :  { %v313_v7 = vsel %vm302_vm7, %v442_v11, 0.0 }
 0x29c   :  { %v314_v12 = vrot.slane %v313_v7, 4 }
 0x29e   :  { %v315_v13 = vadd.f32 %v314_v12, %v313_v7 }
 0x2a0   :  { %v316_v14 = vrot.slane %v315_v13, 2 }
 0x2a2   :  { %v317_v15 = vadd.f32 %v316_v14, %v315_v13 }
 0x2a4   :  { %v318_v16 = vrot.slane %v317_v15, 1 }
 0x2a6   :  { %v319_v17 = vadd.f32 %v318_v16, %v317_v15 }
 0x2a8   :  { %443 = vrcp.f32 %v319_v17 }
 0x2b2   :  { %v444_v18 = vpop.eup %443 }
 0x2b3   :  { %v321_v19 = vmul.f32 %v444_v18, %v442_v11 }
 0x2b5   :  { %322 = vst [vmem:[#allocation7] sm:$0xf] %v321_v19 }
 0x2b6   :  { %500 = shalt.err (!%p497_p6)
}
 0x2b7   :  { %s501_s10 = scalar_lea.hbm %s617_s2, 64 }
 0x2b8   :  { %p502_p7 = scmp.ne.s32.totalorder %s617_s2, %s501_s10  ;;  %p505_p8 = scmp.lt.u32.totalorder %s501_s10, %s617_s2 }
 0x2ba   :  { %p507_p9 = pnand %p505_p8, %p502_p7 }
 0x2bc   :  { %510 = shalt.err (!%p507_p9)
}
 0x2bd   :  { %332 = dma.vmem_to_hbm [thread:$0]  %s330_s6, 64, %s617_s2, [#allocation4]  }
 0x2be   :  { %515 = dma.done.wait [#allocation4], 64  }
 0x2bf   :  { %516 = vsyncadd [#allocation4], 4294967232 }
 0x2c0   :  { %336 = vsyncpa [#allocation3], 1 }
 0x2c1   :  { %337 = vsyncpa [#allocation6], 1 }
 0x2c2   :  { %338 = vsyncpa [#allocation4], 1 }

</bundles_post_ra>
